<compile_context>
chip_gen: v6e
topology: v6e:2x2x1
jax: 0.10.0
libtpu: 0.0.40
codegen_flags: <defaults>
</compile_context>

<pallas_src>
import functools
import math

import jax
import jax.numpy as jnp
from jax import lax
from jax.experimental import pallas as pl
from jax.experimental.pallas import tpu as pltpu

S_SCALE = 45.0          # ArcFaceAdaptiveMargin(s=45.0)
SUBCENTER_K = 3         # ArcMarginProduct_subcenter(k=3)
EPS = 1e-12             # F.normalize default eps
_SQRT_2_OVER_PI = math.sqrt(2.0 / math.pi)


def _gelu_tanh(x):
    # TODO(synk): nn.GELU() defaults to the exact erf formulation; the tanh
    # approximation is used because erf has no guaranteed Mosaic lowering.
    return 0.5 * x * (1.0 + jnp.tanh(_SQRT_2_OVER_PI *
                                     (x + 0.044715 * x * x * x)))


# -----------------------------------------------------------------------------
# Generation-aware VMEM budgeting.
# -----------------------------------------------------------------------------
_VMEM_CAP = None


def _vmem_capacity_bytes():
    global _VMEM_CAP
    if _VMEM_CAP is None:
        try:
            _VMEM_CAP = int(pltpu.get_tpu_info().vmem_capacity_bytes)
        except Exception:
            _VMEM_CAP = 64 << 20          # conservative (v7x per-TC) fallback
    return _VMEM_CAP


def _weight_budget_bytes(capacity):
    # ~28-32 MiB of double-buffered weights on v7x (64 MiB VMEM/TC),
    # capped at 48 MiB on v5e/v6e (128 MiB VMEM).
    return int(min(int(0.45 * capacity), 48 << 20))


def _auto_out_tile(out_features, in_features, k, capacity):
    """Largest 128-multiple class tile whose double-buffered bf16 weight block
    fits the generation-aware budget and divides (padded) out_features."""
    budget = _weight_budget_bytes(capacity)
    t = budget // (2 * k * in_features * 2)       # bf16 = 2 bytes, 2 buffers
    t = (t // 128) * 128
    if t < 128:
        t = 128
    if out_features <= t:
        return int(out_features)
    while out_features % t:
        t -= 128
        if t < 128:
            # out_features is padded to a multiple of 512 at build time, so we
            # never get here; defensive fallback avoids a degenerate full block.
            return 128 if out_features % 128 == 0 else int(out_features)
    return int(t)


# -----------------------------------------------------------------------------
# Projector: Linear(dim,h) -> GELU -> Linear(h,e) -> GELU -> Linear(e,e), fused,
# bf16 weights/activations with f32 accumulation.
# -----------------------------------------------------------------------------
def _projector_kernel(x_ref, w1_ref, b1_ref, w2_ref, b2_ref, w3_ref, b3_ref,
                      o_ref):
    x = x_ref[...]                                                    # bf16
    h = jnp.dot(x, w1_ref[...], preferred_element_type=jnp.float32) + b1_ref[...]
    h = _gelu_tanh(h)
    h = jnp.dot(h.astype(jnp.bfloat16), w2_ref[...],
                preferred_element_type=jnp.float32) + b2_ref[...]
    h = _gelu_tanh(h)
    h = jnp.dot(h.astype(jnp.bfloat16), w3_ref[...],
                preferred_element_type=jnp.float32) + b3_ref[...]
    o_ref[...] = h.astype(o_ref.dtype)


def projector_forward(x, w1, b1, w2, b2, w3, b3, *, batch_tile=None,
                      vmem_capacity=None):
    b, dim = x.shape
    h_dim = w1.shape[1]
    e_dim = w3.shape[1]
    tb = b if batch_tile is None else min(batch_tile, b)
    assert b % tb == 0
    cap = vmem_capacity or _vmem_capacity_bytes()

    w_bytes = 2 * (dim * h_dim + h_dim * e_dim + e_dim * e_dim) * 2   # bf16 x2
    b_bytes = 2 * (h_dim + 2 * e_dim) * 4
    io_bytes = 2 * tb * dim * 2 + 2 * tb * e_dim * 4
    act_bytes = tb * (h_dim + e_dim) * 4 * 2
    limit = w_bytes + b_bytes + io_bytes + act_bytes + (8 << 20)
    limit = int(min(max(limit, 24 << 20), (cap * 3) // 4))

    full = lambda i: (0, 0)
    return pl.pallas_call(
        _projector_kernel,
        out_shape=jax.ShapeDtypeStruct((b, e_dim), jnp.float32),
        grid_spec=pltpu.PrefetchScalarGridSpec(
            num_scalar_prefetch=0,
            grid=(b // tb,),
            in_specs=[
                pl.BlockSpec((tb, dim), lambda i: (i, 0)),
                pl.BlockSpec((dim, h_dim), full),
                pl.BlockSpec((1, h_dim), full),
                pl.BlockSpec((h_dim, e_dim), full),
                pl.BlockSpec((1, e_dim), full),
                pl.BlockSpec((e_dim, e_dim), full),
                pl.BlockSpec((1, e_dim), full),
            ],
            out_specs=pl.BlockSpec((tb, e_dim), lambda i: (i, 0)),
        ),
        compiler_params=pltpu.CompilerParams(
            dimension_semantics=("parallel",),
            vmem_limit_bytes=limit),
    )(x, w1, b1, w2, b2, w3, b3)


# -----------------------------------------------------------------------------
# ArcFace adaptive-margin head: class-dimension streaming kernel.
# Weights are pre-normalized bf16 (k, in, out_padded) -> the kernel body is
# only k MXU matmuls + running max + one-hot margin scatter + lane-dense store.
# -----------------------------------------------------------------------------
def _arcface_head_kernel(e_ref, w_ref, label_ref, phi_ref, out_ref):
    tile_cols = out_ref.shape[-1]
    col0 = pl.program_id(0) * tile_cols

    e = e_ref[...]                                                    # (B, IN) bf16
    cos = jnp.dot(e, w_ref[0], preferred_element_type=jnp.float32)   # (B, T) f32
    for j in range(1, w_ref.shape[0]):                                # k sub-centers
        cos = jnp.maximum(
            cos, jnp.dot(e, w_ref[j], preferred_element_type=jnp.float32))

    # NOTE: out-of-range / ignore labels (e.g. -1) never match -> pure cosine
    # row, matching the 'val' path; PyTorch's one_hot would error instead.
    col = lax.broadcasted_iota(jnp.int32, cos.shape, 1) + col0
    is_target = col == label_ref[...]                                 # (B,T) vs (B,1)
    out_ref[...] = jnp.where(is_target, phi_ref[...], cos) * S_SCALE


def _head_vmem_limit(b, in_features, k, tile_out, capacity):
    w_bufs = 2 * k * in_features * tile_out * 2     # double-buffered bf16 weights
    o_bufs = 2 * b * tile_out * 4                   # double-buffered f32 out block
    e_bufs = 2 * b * in_features * 2                # resident bf16 embeddings
    misc = 4 * b * 4 * 2                            # labels / phi blocks
    limit = w_bufs + o_bufs + e_bufs + misc + (8 << 20)   # compiler headroom
    return int(min(max(limit, 24 << 20), (capacity * 3) // 4))


def arcface_head_pallas(e_n_bf16, w_kio_bf16, labels2d, phi2d, *, tile_out,
                        vmem_capacity=None):
    b, in_features = e_n_bf16.shape
    k, _, out_padded = w_kio_bf16.shape
    assert out_padded % tile_out == 0, (out_padded, tile_out)
    cap = vmem_capacity or _vmem_capacity_bytes()
    limit = _head_vmem_limit(b, in_features, k, tile_out, cap)
    return pl.pallas_call(
        _arcface_head_kernel,
        out_shape=jax.ShapeDtypeStruct((b, out_padded), jnp.float32),
        grid_spec=pltpu.PrefetchScalarGridSpec(
            num_scalar_prefetch=0,
            grid=(out_padded // tile_out,),
            in_specs=[
                pl.BlockSpec((b, in_features), lambda t: (0, 0)),
                pl.BlockSpec((k, in_features, tile_out), lambda t: (0, 0, t)),
                pl.BlockSpec((b, 1), lambda t: (0, 0)),
                pl.BlockSpec((b, 1), lambda t: (0, 0)),
            ],
            out_specs=pl.BlockSpec((b, tile_out), lambda t: (0, t)),
        ),
        compiler_params=pltpu.CompilerParams(
            dimension_semantics=("parallel",),     # megacore-shardable on v7x
            vmem_limit_bytes=limit),
    )(e_n_bf16, w_kio_bf16, labels2d, phi2d)


def _target_phi(e_f32, w_kio_norm_bf16, labels, margins):
    """Per-sample margin logit (tiny wrapper pre-pass, O(B*k*in)).

    Uses the same pre-normalized bf16 weights / bf16-quantized embeddings as
    the streaming kernel so the on-target logit tracks the kernel's cos path.
    """
    w_lbl = jnp.take(w_kio_norm_bf16, labels, axis=2).astype(jnp.float32)  # (k,in,B)
    dots = jnp.einsum('bi,jib->bj', e_f32, w_lbl)                          # (B, k)
    target_logit = jnp.max(dots, axis=1)                                   # (B,)

    m = jnp.take(margins, labels)
    cos_m, sin_m = jnp.cos(m), jnp.sin(m)
    th = jnp.cos(math.pi - m)
    mm = jnp.sin(math.pi - m) * m
    # Guard: rounding can push target_logit^2 slightly above 1 (bf16 weights).
    sine = jnp.sqrt(jnp.maximum(0.0, 1.0 - target_logit * target_logit))
    phi = target_logit * cos_m - sine * sin_m
    phi = jnp.where(target_logit > th, phi, target_logit - mm)
    return phi


@functools.partial(jax.jit, static_argnames=("split", "tile_out"))
def clipvitl_model2_forward(params, vit_features, labels, split="train",
                            tile_out=None):
    """ClipvitlModel2.forward minus the CLIP ViT backbone.

    vit_features: (B, dim) pooled visual features, labels: (B,) int32.
    Returns (B, n_class) float32 margin logits (already scaled by s).
    In production the batch should be padded/accumulated to >=128 (v5e) /
    >=256 (v6e/v7x) so the dominant head-weight HBM stream is amortized.
    """
    # TODO(synk): clip_model.visual (ViT-L/14@336px pretrained backbone) has no
    # in-script Pallas equivalent; this forward starts from its pooled output.
    cap = _vmem_capacity_bytes()
    feats = projector_forward(
        vit_features.astype(jnp.bfloat16),
        params["w1"], params["b1"], params["w2"], params["b2"],
        params["w3"], params["b3"], vmem_capacity=cap)

    b = feats.shape[0]
    n_class = params["margins"].shape[0]
    w_kio = params["head_w_kio_bf16"]         # (k, in, out_padded) bf16, normalized
    k, in_features, out_padded = w_kio.shape
    if tile_out is None:
        tile_out = _auto_out_tile(out_padded, in_features, k, cap)

    # F.normalize(features): done once here (tiny) so the streaming kernel only
    # has to read the pre-normalized bf16 class weights.
    e_n = feats / jnp.maximum(
        jnp.sqrt(jnp.sum(feats * feats, axis=1, keepdims=True)), EPS)
    e_bf16 = e_n.astype(jnp.bfloat16)

    if split == "val":
        # 'val' returns s * cosine: disable the scatter with impossible labels.
        labels2d = jnp.full((b, 1), -1, dtype=jnp.int32)
        phi2d = jnp.zeros((b, 1), dtype=jnp.float32)
    else:
        phi = _target_phi(e_bf16.astype(jnp.float32), w_kio, labels,
                          params["margins"])
        labels2d = labels.reshape(b, 1).astype(jnp.int32)
        phi2d = phi.reshape(b, 1).astype(jnp.float32)

    logits = arcface_head_pallas(e_bf16, w_kio, labels2d, phi2d,
                                 tile_out=tile_out, vmem_capacity=cap)
    return logits[:, :n_class]                # drop padded (zero-weight) classes


# -----------------------------------------------------------------------------
# Parameter construction + pure-JAX (PyTorch-faithful) reference.
# -----------------------------------------------------------------------------
def build_params(key, dim, h_dim, embed_dim, n_class, k=SUBCENTER_K,
                 class_pad=512):
    ks = jax.random.split(key, 8)

    def linear_init(kw, kb, fan_in, fan_out):
        bound = 1.0 / math.sqrt(fan_in)
        w = jax.random.uniform(kw, (fan_in, fan_out), jnp.float32, -bound, bound)
        bias = jax.random.uniform(kb, (1, fan_out), jnp.float32, -bound, bound)
        return w, bias

    w1, b1 = linear_init(ks[0], ks[1], dim, h_dim)
    w2, b2 = linear_init(ks[2], ks[3], h_dim, embed_dim)
    w3, b3 = linear_init(ks[4], ks[5], embed_dim, embed_dim)

    # ArcMarginProduct_subcenter weight: (out*k, in), U(-1/sqrt(in), 1/sqrt(in))
    stdv = 1.0 / math.sqrt(embed_dim)
    head_w = jax.random.uniform(ks[6], (n_class * k, embed_dim), jnp.float32,
                                -stdv, stdv)

    # TODO(synk): the original builds per-class margins from class counts in
    # '../split_path/train_split_reduce.txt'; a deterministic in-script table
    # with the same [0.07, 0.52] range is used instead.
    margins = 0.07 + 0.45 * jax.random.uniform(ks[7], (n_class,), jnp.float32)

    # Hoisted F.normalize: normalize rows once in f32, then pack into the
    # streaming-friendly layout (k, in, out_padded) bf16, classes on lanes.
    norm = jnp.sqrt(jnp.sum(head_w * head_w, axis=1, keepdims=True))
    head_w_n = head_w / jnp.maximum(norm, EPS)
    w_oki = head_w_n.reshape(n_class, k, embed_dim)
    n_pad = ((n_class + class_pad - 1) // class_pad) * class_pad
    if n_pad != n_class:
        w_oki = jnp.pad(w_oki, ((0, n_pad - n_class), (0, 0), (0, 0)))
    head_w_kio = jnp.transpose(w_oki, (1, 2, 0)).astype(jnp.bfloat16)

    params = {
        "w1": w1.astype(jnp.bfloat16), "b1": b1,
        "w2": w2.astype(jnp.bfloat16), "b2": b2,
        "w3": w3.astype(jnp.bfloat16), "b3": b3,
        "head_w_kio_bf16": head_w_kio, "margins": margins,
    }
    return params, head_w


def _reference_forward(params, head_w_f32, vit_features, labels, split):
    hi = lax.Precision.HIGHEST
    x = vit_features.astype(jnp.float32)
    w1 = params["w1"].astype(jnp.float32)
    w2 = params["w2"].astype(jnp.float32)
    w3 = params["w3"].astype(jnp.float32)
    x = _gelu_tanh(jnp.dot(x, w1, precision=hi) + params["b1"])
    x = _gelu_tanh(jnp.dot(x, w2, precision=hi) + params["b2"])
    x = jnp.dot(x, w3, precision=hi) + params["b3"]

    b = x.shape[0]
    n_class = params["margins"].shape[0]
    e_n = x / jnp.maximum(jnp.linalg.norm(x, axis=1, keepdims=True), EPS)
    w_n = head_w_f32 / jnp.maximum(
        jnp.linalg.norm(head_w_f32, axis=1, keepdims=True), EPS)
    cos_all = jnp.dot(e_n, w_n.T, precision=hi)              # (B, out*k)
    cos = jnp.max(cos_all.reshape(b, n_class, SUBCENTER_K), axis=2)
    if split == "val":
        return cos * S_SCALE

    m = params["margins"][labels]
    cos_m, sin_m = jnp.cos(m), jnp.sin(m)
    th = jnp.cos(math.pi - m)
    mm = jnp.sin(math.pi - m) * m
    tl = cos[jnp.arange(b), labels]
    sine = jnp.sqrt(jnp.maximum(0.0, 1.0 - tl * tl))
    phi = jnp.where(tl > th, tl * cos_m - sine * sin_m, tl - mm)
    onehot = jnp.arange(n_class)[None, :] == labels[:, None]
    return S_SCALE * jnp.where(onehot, phi[:, None], cos)


if __name__ == "__main__":
    B = 8            # real training would pad/accumulate to >=128
    DIM = 128        # 768 in the real model (ViT-L pooled feature)
    H_DIM = 128      # 1024 in the real model
    EMBED = 128      # 1024 in the real model
    N_CLASS = 512    # ~124k classes in the real model (padded to 512-multiples)
    TILE_OUT = 128   # small tile so the demo exercises a 4-step streaming grid

    key = jax.random.PRNGKey(0)
    k_params, k_feat, k_lab = jax.random.split(key, 3)
    params, head_w_f32 = build_params(k_params, DIM, H_DIM, EMBED, N_CLASS)
    vit_features = jax.random.normal(k_feat, (B, DIM), dtype=jnp.float32)
    labels = jax.random.randint(k_lab, (B,), 0, N_CLASS, dtype=jnp.int32)

    out_train = clipvitl_model2_forward(params, vit_features, labels,
                                        split="train", tile_out=TILE_OUT)
    out_train = jax.block_until_ready(out_train)
    out_val = clipvitl_model2_forward(params, vit_features, labels,
                                      split="val", tile_out=TILE_OUT)
    out_val = jax.block_until_ready(out_val)

    # Also exercise the generation-aware auto-tiler path once.
    out_auto = clipvitl_model2_forward(params, vit_features, labels,
                                       split="train")
    out_auto = jax.block_until_ready(out_auto)

    ref_train = _reference_forward(params, head_w_f32, vit_features, labels,
                                   "train")
    ref_val = _reference_forward(params, head_w_f32, vit_features, labels,
                                 "val")

    assert out_train.shape == (B, N_CLASS) and out_train.dtype == jnp.float32
    assert out_val.shape == (B, N_CLASS)
    assert out_auto.shape == (B, N_CLASS)
    # bf16 weight/activation streaming vs the all-f32 HIGHEST reference: keep a
    # loose absolute tolerance on the s=45-scaled logits (~4% of the scale).
    assert bool(jnp.allclose(out_train, ref_train, atol=2.0)), float(
        jnp.max(jnp.abs(out_train - ref_train)))
    assert bool(jnp.allclose(out_val, ref_val, atol=2.0)), float(
        jnp.max(jnp.abs(out_val - ref_val)))
    assert bool(jnp.allclose(out_auto, ref_train, atol=2.0)), float(
        jnp.max(jnp.abs(out_auto - ref_train)))
    print("KERNEL_OK")
</pallas_src>

<mosaic_0001>
module attributes {stable_mosaic.version = 11 : i64} {
  func.func @_projector_kernel(%arg0: i32, %arg1: memref<8x128xbf16, #tpu.memory_space<vmem>>, %arg2: memref<128x128xbf16, #tpu.memory_space<vmem>>, %arg3: memref<1x128xf32, #tpu.memory_space<vmem>>, %arg4: memref<128x128xbf16, #tpu.memory_space<vmem>>, %arg5: memref<1x128xf32, #tpu.memory_space<vmem>>, %arg6: memref<128x128xbf16, #tpu.memory_space<vmem>>, %arg7: memref<1x128xf32, #tpu.memory_space<vmem>>, %arg8: memref<8x128xf32, #tpu.memory_space<vmem>>) attributes {dimension_semantics = [#tpu.dimension_semantics<parallel>], iteration_bounds = array<i64: 1>, scalar_prefetch = 0 : i64, scratch_operands = 0 : i64, tpu.core_type = #tpu.core_type<tc>, window_params = [{transform_indices = @transform_0, window_bounds = array<i64: 8, 128>}, {pipeline_mode = #tpu.pipeline_mode<synchronous>, transform_indices = @transform_1, window_bounds = array<i64: 128, 128>}, {pipeline_mode = #tpu.pipeline_mode<synchronous>, transform_indices = @transform_2, window_bounds = array<i64: 1, 128>}, {pipeline_mode = #tpu.pipeline_mode<synchronous>, transform_indices = @transform_3, window_bounds = array<i64: 128, 128>}, {pipeline_mode = #tpu.pipeline_mode<synchronous>, transform_indices = @transform_4, window_bounds = array<i64: 1, 128>}, {pipeline_mode = #tpu.pipeline_mode<synchronous>, transform_indices = @transform_5, window_bounds = array<i64: 128, 128>}, {pipeline_mode = #tpu.pipeline_mode<synchronous>, transform_indices = @transform_6, window_bounds = array<i64: 1, 128>}, {transform_indices = @transform_7, window_bounds = array<i64: 8, 128>}]} {
    %c0 = arith.constant 0 : index
    %c0_0 = arith.constant 0 : index
    %0 = vector.load %arg1[%c0, %c0_0] : memref<8x128xbf16, #tpu.memory_space<vmem>>, vector<8x128xbf16>
    %c0_1 = arith.constant 0 : index
    %c0_2 = arith.constant 0 : index
    %1 = vector.load %arg2[%c0_1, %c0_2] : memref<128x128xbf16, #tpu.memory_space<vmem>>, vector<128x128xbf16>
    %cst = arith.constant dense<0.000000e+00> : vector<8x128xf32>
    %2 = tpu.matmul %0, %1, %cst {dimension_numbers = #tpu.dot_dimension_numbers<[1], [0], [0], [1], [0, 0, 1, 1], [], []>} : vector<8x128xbf16>, vector<128x128xbf16>, vector<8x128xf32> -> vector<8x128xf32>
    %c0_3 = arith.constant 0 : index
    %c0_4 = arith.constant 0 : index
    %3 = vector.load %arg3[%c0_3, %c0_4] : memref<1x128xf32, #tpu.memory_space<vmem>>, vector<1x128xf32>
    %4 = vector.broadcast %3 : vector<1x128xf32> to vector<8x128xf32>
    %5 = arith.addf %2, %4 : vector<8x128xf32>
    %cst_5 = arith.constant 5.000000e-01 : f32
    %6 = vector.broadcast %cst_5 : f32 to vector<8x128xf32>
    %7 = arith.mulf %6, %5 : vector<8x128xf32>
    %cst_6 = arith.constant 4.471500e-02 : f32
    %8 = vector.broadcast %cst_6 : f32 to vector<8x128xf32>
    %9 = arith.mulf %8, %5 : vector<8x128xf32>
    %10 = arith.mulf %9, %5 : vector<8x128xf32>
    %11 = arith.mulf %10, %5 : vector<8x128xf32>
    %12 = arith.addf %5, %11 : vector<8x128xf32>
    %cst_7 = arith.constant 0.797884583 : f32
    %13 = vector.broadcast %cst_7 : f32 to vector<8x128xf32>
    %14 = arith.mulf %13, %12 : vector<8x128xf32>
    %15 = math.tanh %14 : vector<8x128xf32>
    %cst_8 = arith.constant 1.000000e+00 : f32
    %16 = vector.broadcast %cst_8 : f32 to vector<8x128xf32>
    %17 = arith.addf %16, %15 : vector<8x128xf32>
    %18 = arith.mulf %7, %17 : vector<8x128xf32>
    %19 = arith.truncf %18 : vector<8x128xf32> to vector<8x128xbf16>
    %c0_9 = arith.constant 0 : index
    %c0_10 = arith.constant 0 : index
    %20 = vector.load %arg4[%c0_9, %c0_10] : memref<128x128xbf16, #tpu.memory_space<vmem>>, vector<128x128xbf16>
    %cst_11 = arith.constant dense<0.000000e+00> : vector<8x128xf32>
    %21 = tpu.matmul %19, %20, %cst_11 {dimension_numbers = #tpu.dot_dimension_numbers<[1], [0], [0], [1], [0, 0, 1, 1], [], []>} : vector<8x128xbf16>, vector<128x128xbf16>, vector<8x128xf32> -> vector<8x128xf32>
    %c0_12 = arith.constant 0 : index
    %c0_13 = arith.constant 0 : index
    %22 = vector.load %arg5[%c0_12, %c0_13] : memref<1x128xf32, #tpu.memory_space<vmem>>, vector<1x128xf32>
    %23 = vector.broadcast %22 : vector<1x128xf32> to vector<8x128xf32>
    %24 = arith.addf %21, %23 : vector<8x128xf32>
    %cst_14 = arith.constant 5.000000e-01 : f32
    %25 = vector.broadcast %cst_14 : f32 to vector<8x128xf32>
    %26 = arith.mulf %25, %24 : vector<8x128xf32>
    %cst_15 = arith.constant 4.471500e-02 : f32
    %27 = vector.broadcast %cst_15 : f32 to vector<8x128xf32>
    %28 = arith.mulf %27, %24 : vector<8x128xf32>
    %29 = arith.mulf %28, %24 : vector<8x128xf32>
    %30 = arith.mulf %29, %24 : vector<8x128xf32>
    %31 = arith.addf %24, %30 : vector<8x128xf32>
    %cst_16 = arith.constant 0.797884583 : f32
    %32 = vector.broadcast %cst_16 : f32 to vector<8x128xf32>
    %33 = arith.mulf %32, %31 : vector<8x128xf32>
    %34 = math.tanh %33 : vector<8x128xf32>
    %cst_17 = arith.constant 1.000000e+00 : f32
    %35 = vector.broadcast %cst_17 : f32 to vector<8x128xf32>
    %36 = arith.addf %35, %34 : vector<8x128xf32>
    %37 = arith.mulf %26, %36 : vector<8x128xf32>
    %38 = arith.truncf %37 : vector<8x128xf32> to vector<8x128xbf16>
    %c0_18 = arith.constant 0 : index
    %c0_19 = arith.constant 0 : index
    %39 = vector.load %arg6[%c0_18, %c0_19] : memref<128x128xbf16, #tpu.memory_space<vmem>>, vector<128x128xbf16>
    %cst_20 = arith.constant dense<0.000000e+00> : vector<8x128xf32>
    %40 = tpu.matmul %38, %39, %cst_20 {dimension_numbers = #tpu.dot_dimension_numbers<[1], [0], [0], [1], [0, 0, 1, 1], [], []>} : vector<8x128xbf16>, vector<128x128xbf16>, vector<8x128xf32> -> vector<8x128xf32>
    %c0_21 = arith.constant 0 : index
    %c0_22 = arith.constant 0 : index
    %41 = vector.load %arg7[%c0_21, %c0_22] : memref<1x128xf32, #tpu.memory_space<vmem>>, vector<1x128xf32>
    %42 = vector.broadcast %41 : vector<1x128xf32> to vector<8x128xf32>
    %43 = arith.addf %40, %42 : vector<8x128xf32>
    %c0_23 = arith.constant 0 : index
    %c0_24 = arith.constant 0 : index
    %44 = vector.load %arg8[%c0_23, %c0_24] : memref<8x128xf32, #tpu.memory_space<vmem>>, vector<8x128xf32>
    tpu.vector_store %arg8[%c0_23, %c0_24], %43 {strides = array<i32>} : memref<8x128xf32, #tpu.memory_space<vmem>>, vector<8x128xf32>,
    return
  }
  func.func @transform_0(%arg0: i32) -> (i32, i32) {
    %c0_i32 = arith.constant 0 : i32
    %c0_i32_0 = arith.constant 0 : i32
    return %arg0, %c0_i32 : i32, i32
  }
  func.func @transform_1(%arg0: i32) -> (i32, i32) {
    %c0_i32 = arith.constant 0 : i32
    %c0_i32_0 = arith.constant 0 : i32
    %c0_i32_1 = arith.constant 0 : i32
    return %c0_i32, %c0_i32_0 : i32, i32
  }
  func.func @transform_2(%arg0: i32) -> (i32, i32) {
    %c0_i32 = arith.constant 0 : i32
    %c0_i32_0 = arith.constant 0 : i32
    %c0_i32_1 = arith.constant 0 : i32
    return %c0_i32, %c0_i32_0 : i32, i32
  }
  func.func @transform_3(%arg0: i32) -> (i32, i32) {
    %c0_i32 = arith.constant 0 : i32
    %c0_i32_0 = arith.constant 0 : i32
    %c0_i32_1 = arith.constant 0 : i32
    return %c0_i32, %c0_i32_0 : i32, i32
  }
  func.func @transform_4(%arg0: i32) -> (i32, i32) {
    %c0_i32 = arith.constant 0 : i32
    %c0_i32_0 = arith.constant 0 : i32
    %c0_i32_1 = arith.constant 0 : i32
    return %c0_i32, %c0_i32_0 : i32, i32
  }
  func.func @transform_5(%arg0: i32) -> (i32, i32) {
    %c0_i32 = arith.constant 0 : i32
    %c0_i32_0 = arith.constant 0 : i32
    %c0_i32_1 = arith.constant 0 : i32
    return %c0_i32, %c0_i32_0 : i32, i32
  }
  func.func @transform_6(%arg0: i32) -> (i32, i32) {
    %c0_i32 = arith.constant 0 : i32
    %c0_i32_0 = arith.constant 0 : i32
    %c0_i32_1 = arith.constant 0 : i32
    return %c0_i32, %c0_i32_0 : i32, i32
  }
  func.func @transform_7(%arg0: i32) -> (i32, i32) {
    %c0_i32 = arith.constant 0 : i32
    %c0_i32_0 = arith.constant 0 : i32
    return %arg0, %c0_i32 : i32, i32
  }
}

module attributes {stable_mosaic.version = 11 : i64} {
  func.func @_arcface_head_kernel(%arg0: i32, %arg1: memref<8x128xbf16, #tpu.memory_space<vmem>>, %arg2: memref<3x128x128xbf16, #tpu.memory_space<vmem>>, %arg3: memref<8x1xi32, #tpu.memory_space<vmem>>, %arg4: memref<8x1xf32, #tpu.memory_space<vmem>>, %arg5: memref<8x128xf32, #tpu.memory_space<vmem>>) attributes {dimension_semantics = [#tpu.dimension_semantics<parallel>], iteration_bounds = array<i64: 4>, scalar_prefetch = 0 : i64, scratch_operands = 0 : i64, tpu.core_type = #tpu.core_type<tc>, window_params = [{pipeline_mode = #tpu.pipeline_mode<synchronous>, transform_indices = @transform_0, window_bounds = array<i64: 8, 128>}, {transform_indices = @transform_1, window_bounds = array<i64: 3, 128, 128>}, {pipeline_mode = #tpu.pipeline_mode<synchronous>, transform_indices = @transform_2, window_bounds = array<i64: 8, 1>}, {pipeline_mode = #tpu.pipeline_mode<synchronous>, transform_indices = @transform_3, window_bounds = array<i64: 8, 1>}, {transform_indices = @transform_4, window_bounds = array<i64: 8, 128>}]} {
    %c128_i32 = arith.constant 128 : i32
    %0 = arith.muli %arg0, %c128_i32 : i32
    %c0 = arith.constant 0 : index
    %c0_0 = arith.constant 0 : index
    %1 = vector.load %arg1[%c0, %c0_0] : memref<8x128xbf16, #tpu.memory_space<vmem>>, vector<8x128xbf16>
    %c0_1 = arith.constant 0 : index
    %c0_2 = arith.constant 0 : index
    %c0_3 = arith.constant 0 : index
    %2 = vector.load %arg2[%c0_1, %c0_2, %c0_3] : memref<3x128x128xbf16, #tpu.memory_space<vmem>>, vector<1x128x128xbf16>
    %3 = vector.shape_cast %2 : vector<1x128x128xbf16> to vector<128x128xbf16>
    %cst = arith.constant dense<0.000000e+00> : vector<8x128xf32>
    %4 = tpu.matmul %1, %3, %cst {dimension_numbers = #tpu.dot_dimension_numbers<[1], [0], [0], [1], [0, 0, 1, 1], [], []>} : vector<8x128xbf16>, vector<128x128xbf16>, vector<8x128xf32> -> vector<8x128xf32>
    %c1 = arith.constant 1 : index
    %c0_4 = arith.constant 0 : index
    %c0_5 = arith.constant 0 : index
    %5 = vector.load %arg2[%c1, %c0_4, %c0_5] : memref<3x128x128xbf16, #tpu.memory_space<vmem>>, vector<1x128x128xbf16>
    %6 = vector.shape_cast %5 : vector<1x128x128xbf16> to vector<128x128xbf16>
    %cst_6 = arith.constant dense<0.000000e+00> : vector<8x128xf32>
    %7 = tpu.matmul %1, %6, %cst_6 {dimension_numbers = #tpu.dot_dimension_numbers<[1], [0], [0], [1], [0, 0, 1, 1], [], []>} : vector<8x128xbf16>, vector<128x128xbf16>, vector<8x128xf32> -> vector<8x128xf32>
    %8 = arith.maximumf %4, %7 : vector<8x128xf32>
    %c2 = arith.constant 2 : index
    %c0_7 = arith.constant 0 : index
    %c0_8 = arith.constant 0 : index
    %9 = vector.load %arg2[%c2, %c0_7, %c0_8] : memref<3x128x128xbf16, #tpu.memory_space<vmem>>, vector<1x128x128xbf16>
    %10 = vector.shape_cast %9 : vector<1x128x128xbf16> to vector<128x128xbf16>
    %cst_9 = arith.constant dense<0.000000e+00> : vector<8x128xf32>
    %11 = tpu.matmul %1, %10, %cst_9 {dimension_numbers = #tpu.dot_dimension_numbers<[1], [0], [0], [1], [0, 0, 1, 1], [], []>} : vector<8x128xbf16>, vector<128x128xbf16>, vector<8x128xf32> -> vector<8x128xf32>
    %12 = arith.maximumf %8, %11 : vector<8x128xf32>
    %13 = tpu.iota {dimensions = array<i32: 1>} : vector<8x128xi32>
    %14 = vector.broadcast %0 : i32 to vector<8x128xi32>
    %15 = arith.addi %13, %14 : vector<8x128xi32>
    %c0_10 = arith.constant 0 : index
    %c0_11 = arith.constant 0 : index
    %16 = vector.load %arg3[%c0_10, %c0_11] : memref<8x1xi32, #tpu.memory_space<vmem>>, vector<8x1xi32>
    %17 = vector.broadcast %16 : vector<8x1xi32> to vector<8x128xi32>
    %18 = arith.cmpi eq, %15, %17 : vector<8x128xi32>
    %c0_12 = arith.constant 0 : index
    %c0_13 = arith.constant 0 : index
    %19 = vector.load %arg4[%c0_12, %c0_13] : memref<8x1xf32, #tpu.memory_space<vmem>>, vector<8x1xf32>
    %20 = vector.shape_cast %19 : vector<8x1xf32> to vector<8x1xf32>
    %21 = vector.broadcast %20 : vector<8x1xf32> to vector<8x128xf32>
    %22 = arith.select %18, %21, %12 : vector<8x128xi1>, vector<8x128xf32>
    %cst_14 = arith.constant 4.500000e+01 : f32
    %23 = vector.broadcast %cst_14 : f32 to vector<8x128xf32>
    %24 = arith.mulf %22, %23 : vector<8x128xf32>
    %c0_15 = arith.constant 0 : index
    %c0_16 = arith.constant 0 : index
    %25 = vector.load %arg5[%c0_15, %c0_16] : memref<8x128xf32, #tpu.memory_space<vmem>>, vector<8x128xf32>
    tpu.vector_store %arg5[%c0_15, %c0_16], %24 {strides = array<i32>} : memref<8x128xf32, #tpu.memory_space<vmem>>, vector<8x128xf32>,
    return
  }
  func.func @transform_0(%arg0: i32) -> (i32, i32) {
    %c0_i32 = arith.constant 0 : i32
    %c0_i32_0 = arith.constant 0 : i32
    %c0_i32_1 = arith.constant 0 : i32
    return %c0_i32, %c0_i32_0 : i32, i32
  }
  func.func @transform_1(%arg0: i32) -> (i32, i32, i32) {
    %c0_i32 = arith.constant 0 : i32
    %c0_i32_0 = arith.constant 0 : i32
    %c0_i32_1 = arith.constant 0 : i32
    return %c0_i32, %c0_i32_0, %arg0 : i32, i32, i32
  }
  func.func @transform_2(%arg0: i32) -> (i32, i32) {
    %c0_i32 = arith.constant 0 : i32
    %c0_i32_0 = arith.constant 0 : i32
    %c0_i32_1 = arith.constant 0 : i32
    return %c0_i32, %c0_i32_0 : i32, i32
  }
  func.func @transform_3(%arg0: i32) -> (i32, i32) {
    %c0_i32 = arith.constant 0 : i32
    %c0_i32_0 = arith.constant 0 : i32
    %c0_i32_1 = arith.constant 0 : i32
    return %c0_i32, %c0_i32_0 : i32, i32
  }
  func.func @transform_4(%arg0: i32) -> (i32, i32) {
    %c0_i32 = arith.constant 0 : i32
    %c0_i32_0 = arith.constant 0 : i32
    return %c0_i32, %arg0 : i32, i32
  }
}

</mosaic_0001>

<bundles_post_ra>
// kernel: clipvitl_model2_forward.2
= control target key start
LH: loop header
LB: loop body
LE: loop exit
PB: predicated region body
PF: predicated region fallthrough
CT: control target
= control target key end

     0   :  { %12 = vsyncpa [#allocation3], 0  ;;  %s743_s0 = inlined_call_operand.vmem [shape: bf16[8,128], index: 0, kind: input, shape index: {}]   ;;  %s744_s1 = inlined_call_operand.hbm [shape: bf16[128,128], index: 1, kind: input, shape index: {}]   ;;  %s745_s2 = inlined_call_operand.vmem [shape: f32[1,128], index: 2, kind: input, shape index: {}]   ;;  %s746_s3 = inlined_call_operand.hbm [shape: bf16[128,128], index: 3, kind: input, shape index: {}]   ;;  %s747_s4 = inlined_call_operand.vmem [shape: f32[1,128], index: 4, kind: input, shape index: {}]   ;;  %s748_s5 = inlined_call_operand.hbm [shape: bf16[128,128], index: 5, kind: input, shape index: {}]   ;;  %s749_s6 = inlined_call_operand.vmem [shape: f32[1,128], index: 6, kind: input, shape index: {}]   ;;  %s750_s7 = inlined_call_operand.vmem [shape: f32[8,128], index: 7, kind: output, shape index: {}]  }
   0x1   :  { %13 = vsyncpa [#allocation5], 0  ;;  %s642_s24 = smov [#allocation4]   ;;  %s643_s26 = smov [#allocation2]  }
   0x2   :  { %s35_s25 = sshll.u32 %s642_s24, 4  ;;  %s21_s27 = sshll.u32 %s643_s26, 4  ;;  %s36_s25 = int_to_ptr.vmem [resolvable:$true] %s35_s25  ;;  %s22_s27 = int_to_ptr.vmem [resolvable:$true] %s21_s27 }
   0x3   :  { %s586_s28 = scalar_lea.vmem %s36_s25, 1024  ;;  %p591_p1 = scmp.lt.s32.totalorder %s36_s25, %s36_s25 }
   0x4   :  { %p587_p0 = scmp.ne.s32.totalorder %s36_s25, %s586_s28  ;;  %p592_p2 = scmp.lt.s32.totalorder %s586_s28, %s586_s28 }
   0x6   :  { %p593_p3 = por %p592_p2, %p591_p1 }
   0x8   :  { %p594_p4 = pnand %p593_p3, %p587_p0 }
   0xa   :  { %597 = shalt.err (!%p594_p4)
}
   0xb   :  { %s644_s29 = smov 64   ;;  %s645_s30 = smov 4  }
   0xc   :  { %41 = dma.hbm_to_vmem [thread:$0]  %s746_s3, 1024, %s36_s25, [#allocation5], %s644_s29, %s644_s29, %s645_s30  }
   0xd   :  { %s606_s10 = scalar_lea.vmem %s22_s27, 1024  ;;  %p611_p6 = scmp.lt.s32.totalorder %s22_s27, %s22_s27 }
   0xe   :  { %p607_p5 = scmp.ne.s32.totalorder %s22_s27, %s606_s10  ;;  %p612_p7 = scmp.lt.s32.totalorder %s606_s10, %s606_s10 }
  0x10   :  { %p613_p8 = por %p612_p7, %p611_p6 }
  0x12   :  { %p614_p9 = pnand %p613_p8, %p607_p5 }
  0x14   :  { %617 = shalt.err (!%p614_p9)
}
  0x15   :  { %27 = dma.hbm_to_vmem [thread:$0]  %s744_s1, 1024, %s22_s27, [#allocation3], %s644_s29, %s644_s29, %s645_s30  }
  0x16   :  { %s646_s13 = smov [#allocation6]  }
  0x17   :  { %s49_s14 = sshll.u32 %s646_s13, 4  ;;  %s50_s14 = int_to_ptr.vmem [resolvable:$true] %s49_s14 }
  0x18   :  { %s626_s15 = scalar_lea.vmem %s50_s14, 1024  ;;  %p631_p11 = scmp.lt.s32.totalorder %s50_s14, %s50_s14 }
  0x19   :  { %p627_p10 = scmp.ne.s32.totalorder %s50_s14, %s626_s15  ;;  %p632_p12 = scmp.lt.s32.totalorder %s626_s15, %s626_s15 }
  0x1b   :  { %p633_p13 = por %p632_p12, %p631_p11 }
  0x1d   :  { %p634_p0 = pnand %p633_p13, %p627_p10 }
  0x1f   :  { %637 = shalt.err (!%p634_p0)
}
  0x20   :  { %55 = dma.hbm_to_vmem [thread:$0]  %s748_s5, 1024, %s50_s14, [#allocation5], %s644_s29, %s644_s29, %s645_s30  }
  0x21   :  { %638 = dma.done.wait [#allocation3], 1024  }
  0x22   :  { %639 = vsyncadd [#allocation3], 4294966272 }
  0x23   :  { %640 = dma.done.wait [#allocation5], 2048  }
  0x24   :  { %641 = vsyncadd [#allocation5], 4294965248  ;;  %v647_v0 = vmov 0.0   ;;  %vm648_vm0 = vmmov 0   ;;  %v550_v1 = vld [vmem:[#allocation2 + $0x38] sm:$0xff]   ;;  %v551_v2 = vld [vmem:[#allocation2 + $0x30] sm:$0xff]  }
  0x25   :  { %483 = vmatprep.subr.bf16.mxu0 %v647_v0  ;;  %499 = vmatprep.mubr.msk.bf16.mxu0 %vm648_vm0, %v647_v0  ;;  %v552_v3 = vld [vmem:[#allocation2 + $0x28] sm:$0xff]   ;;  %v553_v4 = vld [vmem:[#allocation2 + $0x20] sm:$0xff]   ;;  %v554_v5 = vld [vmem:[#allocation2 + $0x18] sm:$0xff]  }
  0x26   :  { %503 = vmatprep.subr.bf16.mxu1 %v647_v0  ;;  %519 = vmatprep.mubr.msk.bf16.mxu1 %vm648_vm0, %v647_v0  ;;  %v555_v6 = vld [vmem:[#allocation2 + $0x10] sm:$0xff]   ;;  %v556_v7 = vld [vmem:[#allocation2 + $0x8] sm:$0xff]   ;;  %v557_v8 = vld [vmem:[#allocation2] sm:$0xff]  }
  0x27   :  { %484 = vmatpush3.bf16.msra.mxu0 %v550_v1  ;;  %v68_v9 = vld [vmem:[%s743_s0] sm:$0xf]  ;;  %v558_v10 = vld [vmem:[#allocation4 + $0x38] sm:$0xff]   ;;  %v559_v11 = vld [vmem:[#allocation4 + $0x30] sm:$0xff]  }
  0x28   :  { %485 = vmatprep.subr.bf16.mxu0 %v647_v0  ;;  %504 = vmatpush3.bf16.msra.mxu1 %v558_v10  ;;  %v560_v12 = vld [vmem:[#allocation4 + $0x28] sm:$0xff]   ;;  %v561_v13 = vld [vmem:[#allocation4 + $0x20] sm:$0xff]   ;;  %v562_v14 = vld [vmem:[#allocation4 + $0x18] sm:$0xff]  }
  0x29   :  { %505 = vmatprep.subr.bf16.mxu1 %v647_v0  ;;  %v563_v15 = vld [vmem:[#allocation4 + $0x10] sm:$0xff]   ;;  %v564_v16 = vld [vmem:[#allocation4 + $0x8] sm:$0xff]   ;;  %v565_v17 = vld [vmem:[#allocation4] sm:$0xff]  }
  0x2a   :  { %v429_v18 = vld [vmem:[%s745_s2] ss:$0 sm:$0xff]  ;;  %v566_v34 = vld [vmem:[#allocation6 + $0x38] sm:$0xff]   ;;  %v567_v35 = vld [vmem:[#allocation6 + $0x30] sm:$0xff]  }
  0x2b   :  { %486 = vmatpush3.bf16.msra.mxu0 %v551_v2  ;;  %v568_v36 = vld [vmem:[#allocation6 + $0x28] sm:$0xff]   ;;  %v569_v37 = vld [vmem:[#allocation6 + $0x20] sm:$0xff]   ;;  %v570_v38 = vld [vmem:[#allocation6 + $0x18] sm:$0xff]  }
  0x2c   :  { %487 = vmatprep.subr.bf16.mxu0 %v647_v0  ;;  %506 = vmatpush3.bf16.msra.mxu1 %v559_v11  ;;  %v571_v39 = vld [vmem:[#allocation6 + $0x10] sm:$0xff]   ;;  %v572_v40 = vld [vmem:[#allocation6 + $0x8] sm:$0xff]   ;;  %v573_v41 = vld [vmem:[#allocation6] sm:$0xff]  }
  0x2d   :  { %507 = vmatprep.subr.bf16.mxu1 %v647_v0  ;;  %v438_v42 = vld [vmem:[%s747_s4] ss:$0 sm:$0xff] }
  0x2e   :  { %v447_v58 = vld [vmem:[%s749_s6] ss:$0 sm:$0xff] }
  0x2f   :  { %488 = vmatpush3.bf16.msra.mxu0 %v552_v3 }
  0x30   :  { %489 = vmatprep.subr.bf16.mxu0 %v647_v0  ;;  %508 = vmatpush3.bf16.msra.mxu1 %v560_v12 }
  0x31   :  { %509 = vmatprep.subr.bf16.mxu1 %v647_v0 }
  0x33   :  { %490 = vmatpush3.bf16.msra.mxu0 %v553_v4 }
  0x34   :  { %491 = vmatprep.subr.bf16.mxu0 %v647_v0  ;;  %510 = vmatpush3.bf16.msra.mxu1 %v561_v13 }
  0x35   :  { %511 = vmatprep.subr.bf16.mxu1 %v647_v0 }
  0x37   :  { %492 = vmatpush3.bf16.msra.mxu0 %v554_v5 }
  0x38   :  { %493 = vmatprep.subr.bf16.mxu0 %v647_v0  ;;  %512 = vmatpush3.bf16.msra.mxu1 %v562_v14 }
  0x39   :  { %513 = vmatprep.subr.bf16.mxu1 %v647_v0 }
  0x3b   :  { %494 = vmatpush3.bf16.msra.mxu0 %v555_v6 }
  0x3c   :  { %495 = vmatprep.subr.bf16.mxu0 %v647_v0  ;;  %514 = vmatpush3.bf16.msra.mxu1 %v563_v15 }
  0x3d   :  { %515 = vmatprep.subr.bf16.mxu1 %v647_v0 }
  0x3f   :  { %496 = vmatpush3.bf16.msra.mxu0 %v556_v7 }
  0x40   :  { %497 = vmatprep.subr.bf16.mxu0 %v647_v0  ;;  %516 = vmatpush3.bf16.msra.mxu1 %v564_v16 }
  0x41   :  { %517 = vmatprep.subr.bf16.mxu1 %v647_v0 }
  0x43   :  { %498 = vmatpush3.bf16.msra.mxu0 %v557_v8 }
  0x44   :  { %523 = vmatprep.subr.bf16.mxu0 %v647_v0  ;;  %518 = vmatpush3.bf16.msra.mxu1 %v565_v17 }
  0x46   :  { %500 = vmatmul.mubr.bf16.vlgmr.msra.gmra.mxu0 %v68_v9 }
  0x47   :  { %539 = vmatprep.mubr.msk.bf16.mxu0 %vm648_vm0, %v647_v0  ;;  %524 = vmatpush3.bf16.msra.mxu0 %v566_v34 }
  0x48   :  { %525 = vmatprep.subr.bf16.mxu0 %v647_v0 }
  0x4b   :  { %526 = vmatpush3.bf16.msra.mxu0 %v567_v35 }
  0x4c   :  { %527 = vmatprep.subr.bf16.mxu0 %v647_v0 }
  0x4f   :  { %528 = vmatpush3.bf16.msra.mxu0 %v568_v36 }
  0x50   :  { %529 = vmatprep.subr.bf16.mxu0 %v647_v0 }
  0x53   :  { %530 = vmatpush3.bf16.msra.mxu0 %v569_v37 }
  0x54   :  { %531 = vmatprep.subr.bf16.mxu0 %v647_v0 }
  0x57   :  { %532 = vmatpush3.bf16.msra.mxu0 %v570_v38 }
  0x58   :  { %533 = vmatprep.subr.bf16.mxu0 %v647_v0 }
  0x5b   :  { %534 = vmatpush3.bf16.msra.mxu0 %v571_v39 }
  0x5c   :  { %535 = vmatprep.subr.bf16.mxu0 %v647_v0 }
  0x5f   :  { %536 = vmatpush3.bf16.msra.mxu0 %v572_v40 }
  0x60   :  { %537 = vmatprep.subr.bf16.mxu0 %v647_v0 }
  0x63   :  { %538 = vmatpush3.bf16.msra.mxu0 %v573_v41 }
 0x106   :  { %v174_v19 = vpop.f32.mrf.mxu0 }
 0x107   :  { %v175_v20 = vadd.f32 %v429_v18, %v174_v19 }
 0x108   :  { %v501_v21 = vpop.f32.mrf.mxu0 }
 0x109   :  { %v181_v22 = vmul.f32 0.044715, %v175_v20  ;;  %v180_v30 = vmul.f32 0.5, %v175_v20 }
 0x10a   :  { %v177_v23 = vpop.f32.mrf.mxu0 }
 0x10b   :  { %v182_v24 = vmul.f32 %v181_v22, %v175_v20 }
 0x10c   :  { %v502_v25 = vpop.f32.mrf.mxu0 }
 0x10d   :  { %v183_v26 = vmul.f32 %v182_v24, %v175_v20 }
 0x10f   :  { %v184_v27 = vadd.f32 %v183_v26, %v175_v20 }
 0x111   :  { %v185_v28 = vmul.f32 0.7978846, %v184_v27 }
 0x113   :  { %574 = vtanh.f32 %v185_v28 }
 0x120   :  { %v575_v29 = vpop.eup %574 }
 0x121   :  { %v187_v31 = vadd.f32 1.0, %v575_v29 }
 0x123   :  { %v188_v32 = vmul.f32 %v187_v31, %v180_v30 }
 0x125   :  { %v189_v33 = vpack.c.bf16 %v188_v32, %v188_v32 }
 0x127   :  { %520 = vmatmul.mubr.bf16.vlgmr.msra.gmra.mxu1 %v189_v33 }
 0x1e7   :  { %v295_v43 = vpop.f32.mrf.mxu1 }
 0x1e8   :  { %v296_v44 = vadd.f32 %v438_v42, %v295_v43 }
 0x1e9   :  { %v521_v45 = vpop.f32.mrf.mxu1 }
 0x1ea   :  { %v302_v46 = vmul.f32 0.044715, %v296_v44  ;;  %v301_v54 = vmul.f32 0.5, %v296_v44 }
 0x1eb   :  { %v298_v47 = vpop.f32.mrf.mxu1 }
 0x1ec   :  { %v303_v48 = vmul.f32 %v302_v46, %v296_v44 }
 0x1ed   :  { %v522_v49 = vpop.f32.mrf.mxu1 }
 0x1ee   :  { %v304_v50 = vmul.f32 %v303_v48, %v296_v44 }
 0x1f0   :  { %v305_v51 = vadd.f32 %v304_v50, %v296_v44 }
 0x1f2   :  { %v306_v52 = vmul.f32 0.7978846, %v305_v51 }
 0x1f4   :  { %576 = vtanh.f32 %v306_v52 }
 0x201   :  { %v577_v53 = vpop.eup %576 }
 0x202   :  { %v308_v55 = vadd.f32 1.0, %v577_v53 }
 0x204   :  { %v309_v56 = vmul.f32 %v308_v55, %v301_v54 }
 0x206   :  { %v310_v57 = vpack.c.bf16 %v309_v56, %v309_v56 }
 0x208   :  { %540 = vmatmul.mubr.bf16.vlgmr.msra.gmra.mxu0 %v310_v57 }
 0x2c8   :  { %v416_v59 = vpop.f32.mrf.mxu0 }
 0x2c9   :  { %v417_v60 = vadd.f32 %v447_v58, %v416_v59 }
 0x2ca   :  { %v541_v61 = vpop.f32.mrf.mxu0 }
 0x2cb   :  { %422 = vst [vmem:[%s750_s7] sm:$0xff] %v417_v60 }
 0x2cc   :  { %v419_v62 = vpop.f32.mrf.mxu0 }
 0x2ce   :  { %v542_v63 = vpop.f32.mrf.mxu0 }
 0x2cf   :  { %427 = vsyncpa [#allocation3], 1 }
 0x2d0   :  { %428 = vsyncpa [#allocation5], 1 }

// kernel: clipvitl_model2_forward.3
= control target key start
LH: loop header
LB: loop body
LE: loop exit
PB: predicated region body
PF: predicated region fallthrough
CT: control target
= control target key end

     0   :  { %9 = vsyncpa [#allocation4], 0  ;;  %s1422_s0 = inlined_call_operand.vmem [shape: bf16[8,128], index: 0, kind: input, shape index: {}]   ;;  %s1423_s1 = inlined_call_operand.vmem [shape: bf16[3,128,512], index: 1, kind: input, shape index: {}]   ;;  %s1424_s2 = inlined_call_operand.vmem [shape: s32[8,1], index: 2, kind: input, shape index: {}]   ;;  %s1425_s3 = inlined_call_operand.vmem [shape: f32[8,1], index: 3, kind: input, shape index: {}]   ;;  %s1426_s4 = inlined_call_operand.hbm [shape: f32[8,512], index: 4, kind: output, shape index: {}]  }
   0x1   :  { %11 = vsyncpa [#allocation4 + $0x1], 0  ;;  %s1157_s15 = smov 0   ;;  %s1159_s16 = smov 0  }
   0x2   :  { %s1161_s17 = smov 0   ;;  %s1163_s18 = smov 0  }
   0x3 LB: > { %s842_s19 = sadd.s32 4294967295, %s1126_s18   ;;  %s843_s20 = sadd.s32 4294967294, %s1126_s18   ;;  %s1126_s18 = sphi %s1163_s18, %s1432_s18   ;;  %s1122_s17 = sphi %s1161_s17, %s1431_s17   ;;  %s1118_s16 = sphi %s1159_s16, %s1430_s16   ;;  %s1114_s15 = sphi %s1157_s15, %s1429_s15  }
   0x4   : > { %s1180_s21 = sadd.s32 1, %s1126_s18   ;;  %s45_s22 = sadd.s32 1, %s1122_s17 }
   0x5   : > { %s42_s23 = ssub.s32 %s1126_s18, %s1180_s21  ;;  %p52_p0 = scmp.ne.s32.totalorder %s1122_s17, %s1118_s16 }
   0x6   : > { %p43_p1 = scmp.eq.s32.totalorder %s42_s23, 0  ;;  %p53_p2 = scmp.eq.s32.totalorder %s1126_s18, 0 }
   0x7   : > { %p124_p3 = scmp.eq.s32.totalorder %s842_s19, 3  ;;  %p129_p4 = scmp.ne.s32.totalorder %s1118_s16, %s1114_s15 }
   0x8   : > { %s1193_s24 = scalar_select %p43_p1, %s1122_s17, %s45_s22  }
   0x9   : > { %p54_p5 = por %p53_p2, %p52_p0  ;;  %p1195_p6 = por %p124_p3, %p52_p0 }
   0xa   : > { %p130_p7 = scmp.eq.s32.totalorder %s843_s20, 3  ;;  %p845_p9 = scmp.ge.s32.totalorder %s1126_s18, 4 }
   0xc   : > { %p1199_p8 = por %p130_p7, %p129_p4  ;;  %155 = sbr.rel (%p845_p9) target bundleno = 53 (0x35), region = 28 }
  0x11   : > { %158 = sbr.rel (!%p54_p5) target bundleno = 53 (0x35), region = 32  ;;  %s160_s27 = sand.u32 (%p54_p5), 1, %s1122_s17  }
  0x12   : > { %s846_s28 = sshll.u32 (%p54_p5), %s1126_s18, 2  ;;  %s997_s29 = smul.u32 (%p54_p5), 192, %s160_s27 }
  0x13   : > { %s1209_s6 = scalar_lea.vmem (%p54_p5), %s1423_s1, %s846_s28 }
  0x14   : > { %v181_v0 = vld [vmem:[%s1209_s6] sm:$0xf] (%p54_p5)  ;;  %v183_v1 = vld [vmem:[%s1209_s6 + $0x10] sm:$0xf] (%p54_p5)  ;;  %s1216_s7 = scalar_lea.vmem (%p54_p5), [#allocation2], %s997_s29 }
  0x15   : > { %v185_v2 = vld [vmem:[%s1209_s6 + $0x20] sm:$0xf] (%p54_p5)  ;;  %v187_v3 = vld [vmem:[%s1209_s6 + $0x30] sm:$0xf] (%p54_p5)  ;;  %182 = vst [vmem:[%s1216_s7] sm:$0xf] (%p54_p5), %v181_v0 }
  0x16   : > { %v189_v4 = vld [vmem:[%s1209_s6 + $0x40] sm:$0xf]  ;;  %184 = vst [vmem:[%s1216_s7 + $0x4] sm:$0xf] %v183_v1  ;;  %186 = vst [vmem:[%s1216_s7 + $0x8] sm:$0xf] %v185_v2 }
  0x17   : > { %188 = vst [vmem:[%s1216_s7 + $0xc] sm:$0xf] %v187_v3  ;;  %190 = vst [vmem:[%s1216_s7 + $0x10] sm:$0xf] %v189_v4  ;;  %v191_v5 = vld [vmem:[%s1209_s6 + $0x50] sm:$0xf] }
  0x18   : > { %v193_v6 = vld [vmem:[%s1209_s6 + $0x60] sm:$0xf]  ;;  %v195_v7 = vld [vmem:[%s1209_s6 + $0x70] sm:$0xf]  ;;  %192 = vst [vmem:[%s1216_s7 + $0x14] sm:$0xf] %v191_v5 }
  0x19   : > { %194 = vst [vmem:[%s1216_s7 + $0x18] sm:$0xf] %v193_v6  ;;  %196 = vst [vmem:[%s1216_s7 + $0x1c] sm:$0xf] %v195_v7  ;;  %v197_v8 = vld [vmem:[%s1209_s6 + $0x80] sm:$0xf] }
  0x1a   : > { %v199_v9 = vld [vmem:[%s1209_s6 + $0x90] sm:$0xf]  ;;  %v201_v10 = vld [vmem:[%s1209_s6 + $0xa0] sm:$0xf]  ;;  %198 = vst [vmem:[%s1216_s7 + $0x20] sm:$0xf] %v197_v8 }
  0x1b   : > { %200 = vst [vmem:[%s1216_s7 + $0x24] sm:$0xf] %v199_v9  ;;  %202 = vst [vmem:[%s1216_s7 + $0x28] sm:$0xf] %v201_v10  ;;  %v203_v11 = vld [vmem:[%s1209_s6 + $0xb0] sm:$0xf] }
  0x1c   : > { %v205_v12 = vld [vmem:[%s1209_s6 + $0xc0] sm:$0xf]  ;;  %v207_v13 = vld [vmem:[%s1209_s6 + $0xd0] sm:$0xf]  ;;  %204 = vst [vmem:[%s1216_s7 + $0x2c] sm:$0xf] %v203_v11 }
  0x1d   : > { %206 = vst [vmem:[%s1216_s7 + $0x30] sm:$0xf] %v205_v12  ;;  %208 = vst [vmem:[%s1216_s7 + $0x34] sm:$0xf] %v207_v13  ;;  %v209_v14 = vld [vmem:[%s1209_s6 + $0xe0] sm:$0xf] }
  0x1e   : > { %v211_v15 = vld [vmem:[%s1209_s6 + $0xf0] sm:$0xf]  ;;  %v213_v16 = vld [vmem:[%s1209_s6 + $0x100] sm:$0xf]  ;;  %210 = vst [vmem:[%s1216_s7 + $0x38] sm:$0xf] %v209_v14 }
  0x1f   : > { %212 = vst [vmem:[%s1216_s7 + $0x3c] sm:$0xf] %v211_v15  ;;  %214 = vst [vmem:[%s1216_s7 + $0x40] sm:$0xf] %v213_v16  ;;  %v215_v17 = vld [vmem:[%s1209_s6 + $0x110] sm:$0xf] }
  0x20   : > { %v217_v18 = vld [vmem:[%s1209_s6 + $0x120] sm:$0xf]  ;;  %v219_v19 = vld [vmem:[%s1209_s6 + $0x130] sm:$0xf]  ;;  %216 = vst [vmem:[%s1216_s7 + $0x44] sm:$0xf] %v215_v17 }
  0x21   : > { %218 = vst [vmem:[%s1216_s7 + $0x48] sm:$0xf] %v217_v18  ;;  %220 = vst [vmem:[%s1216_s7 + $0x4c] sm:$0xf] %v219_v19  ;;  %v221_v20 = vld [vmem:[%s1209_s6 + $0x140] sm:$0xf] }
  0x22   : > { %v223_v21 = vld [vmem:[%s1209_s6 + $0x150] sm:$0xf]  ;;  %v225_v22 = vld [vmem:[%s1209_s6 + $0x160] sm:$0xf]  ;;  %222 = vst [vmem:[%s1216_s7 + $0x50] sm:$0xf] %v221_v20 }
  0x23   : > { %224 = vst [vmem:[%s1216_s7 + $0x54] sm:$0xf] %v223_v21  ;;  %226 = vst [vmem:[%s1216_s7 + $0x58] sm:$0xf] %v225_v22  ;;  %v227_v23 = vld [vmem:[%s1209_s6 + $0x170] sm:$0xf] }
  0x24   : > { %v229_v24 = vld [vmem:[%s1209_s6 + $0x180] sm:$0xf]  ;;  %v231_v25 = vld [vmem:[%s1209_s6 + $0x190] sm:$0xf]  ;;  %228 = vst [vmem:[%s1216_s7 + $0x5c] sm:$0xf] %v227_v23 }
  0x25   : > { %230 = vst [vmem:[%s1216_s7 + $0x60] sm:$0xf] %v229_v24  ;;  %232 = vst [vmem:[%s1216_s7 + $0x64] sm:$0xf] %v231_v25  ;;  %v233_v26 = vld [vmem:[%s1209_s6 + $0x1a0] sm:$0xf] }
  0x26   : > { %v235_v27 = vld [vmem:[%s1209_s6 + $0x1b0] sm:$0xf]  ;;  %v237_v28 = vld [vmem:[%s1209_s6 + $0x1c0] sm:$0xf]  ;;  %234 = vst [vmem:[%s1216_s7 + $0x68] sm:$0xf] %v233_v26 }
  0x27   : > { %236 = vst [vmem:[%s1216_s7 + $0x6c] sm:$0xf] %v235_v27  ;;  %238 = vst [vmem:[%s1216_s7 + $0x70] sm:$0xf] %v237_v28  ;;  %v239_v29 = vld [vmem:[%s1209_s6 + $0x1d0] sm:$0xf] }
  0x28   : > { %v241_v30 = vld [vmem:[%s1209_s6 + $0x1e0] sm:$0xf]  ;;  %v243_v31 = vld [vmem:[%s1209_s6 + $0x1f0] sm:$0xf]  ;;  %240 = vst [vmem:[%s1216_s7 + $0x74] sm:$0xf] %v239_v29 }
  0x29   : > { %242 = vst [vmem:[%s1216_s7 + $0x78] sm:$0xf] %v241_v30  ;;  %244 = vst [vmem:[%s1216_s7 + $0x7c] sm:$0xf] %v243_v31  ;;  %v245_v32 = vld [vmem:[%s1209_s6 + $0x200] sm:$0xf] }
  0x2a   : > { %v247_v33 = vld [vmem:[%s1209_s6 + $0x210] sm:$0xf]  ;;  %v249_v34 = vld [vmem:[%s1209_s6 + $0x220] sm:$0xf]  ;;  %246 = vst [vmem:[%s1216_s7 + $0x80] sm:$0xf] %v245_v32 }
  0x2b   : > { %248 = vst [vmem:[%s1216_s7 + $0x84] sm:$0xf] %v247_v33  ;;  %250 = vst [vmem:[%s1216_s7 + $0x88] sm:$0xf] %v249_v34  ;;  %v251_v35 = vld [vmem:[%s1209_s6 + $0x230] sm:$0xf] }
  0x2c   : > { %v253_v36 = vld [vmem:[%s1209_s6 + $0x240] sm:$0xf]  ;;  %v255_v37 = vld [vmem:[%s1209_s6 + $0x250] sm:$0xf]  ;;  %252 = vst [vmem:[%s1216_s7 + $0x8c] sm:$0xf] %v251_v35 }
  0x2d   : > { %254 = vst [vmem:[%s1216_s7 + $0x90] sm:$0xf] %v253_v36  ;;  %256 = vst [vmem:[%s1216_s7 + $0x94] sm:$0xf] %v255_v37  ;;  %v257_v38 = vld [vmem:[%s1209_s6 + $0x260] sm:$0xf] }
  0x2e   : > { %v259_v39 = vld [vmem:[%s1209_s6 + $0x270] sm:$0xf]  ;;  %v261_v40 = vld [vmem:[%s1209_s6 + $0x280] sm:$0xf]  ;;  %258 = vst [vmem:[%s1216_s7 + $0x98] sm:$0xf] %v257_v38 }
  0x2f   : > { %260 = vst [vmem:[%s1216_s7 + $0x9c] sm:$0xf] %v259_v39  ;;  %262 = vst [vmem:[%s1216_s7 + $0xa0] sm:$0xf] %v261_v40  ;;  %v263_v41 = vld [vmem:[%s1209_s6 + $0x290] sm:$0xf] }
  0x30   : > { %v265_v42 = vld [vmem:[%s1209_s6 + $0x2a0] sm:$0xf]  ;;  %v267_v43 = vld [vmem:[%s1209_s6 + $0x2b0] sm:$0xf]  ;;  %264 = vst [vmem:[%s1216_s7 + $0xa4] sm:$0xf] %v263_v41 }
  0x31   : > { %266 = vst [vmem:[%s1216_s7 + $0xa8] sm:$0xf] %v265_v42  ;;  %268 = vst [vmem:[%s1216_s7 + $0xac] sm:$0xf] %v267_v43  ;;  %v269_v44 = vld [vmem:[%s1209_s6 + $0x2c0] sm:$0xf] }
  0x32   : > { %v271_v45 = vld [vmem:[%s1209_s6 + $0x2d0] sm:$0xf]  ;;  %v273_v46 = vld [vmem:[%s1209_s6 + $0x2e0] sm:$0xf]  ;;  %270 = vst [vmem:[%s1216_s7 + $0xb0] sm:$0xf] %v269_v44 }
  0x33   : > { %272 = vst [vmem:[%s1216_s7 + $0xb4] sm:$0xf] %v271_v45  ;;  %274 = vst [vmem:[%s1216_s7 + $0xb8] sm:$0xf] %v273_v46  ;;  %v275_v47 = vld [vmem:[%s1209_s6 + $0x2f0] sm:$0xf] }
  0x34   : > { %276 = vst [vmem:[%s1216_s7 + $0xbc] sm:$0xf] %v275_v47 }
  0x35 PF: > { %p847_p10 = scmp.ge.s32.totalorder %s1126_s18, 1  ;;  %p395_p11 = scmp.lt.s32.totalorder %s1126_s18, 5 }
  0x37   : > { %p396_p12 = pnand %p847_p10, %p395_p11 }
  0x38   : > { %s1312_s8 = sand.u32 (!%p396_p12), 1, %s1118_s16   ;;  %s849_s23 = sshll.u32 (!%p396_p12), %s842_s19, 7 }
  0x39   : > { %399 = sbr.rel (%p396_p12) target bundleno = 339 (0x153), region = 73  ;;  %s848_s27 = sshll.u32 (!%p396_p12), %s1312_s8, 3 }
  0x3a   : > { %s998_s9 = smul.u32 (!%p396_p12), 192, %s1312_s8  ;;  %s426_s28 = scalar_lea.vmem (!%p396_p12), [#allocation3], %s848_s27 }
  0x3b   : > { %s778_s29 = sshll.u32 (!%p396_p12), %s426_s28, 4  ;;  %s1386_s5 = scalar_lea.hbm (!%p396_p12), %s1426_s4, %s849_s23  ;;  %s779_s29 = int_to_ptr.vmem [resolvable:$true] %s778_s29 }
  0x3c   : > { %s1327_s14 = scalar_lea.vmem (!%p396_p12), [#allocation2], %s998_s9  ;;  %s765_s6 = scalar_lea.sflag (!%p396_p12), [#allocation4], %s1312_s8 }
  0x3d   : > { %s1066_s7 = scalar_lea.vmem (!%p396_p12), %s779_s29, 128  ;;  %s1131_s9 = smov (!%p396_p12), [#allocation3]  }
  0x3e   : > { %v1128_v48 = vmov 0.0   ;;  %v750_v49 = vld [vmem:[%s1424_s2] sm:$0xff]  ;;  %vm1129_vm0 = vmmov 0   ;;  %v1130_v50 = vmov 0   ;;  %v1042_v52 = vld [vmem:[%s1327_s14 + $0x38] sm:$0xff]   ;;  %v1044_v54 = vld [vmem:[%s1327_s14 + $0x30] sm:$0xff]   ;;  %v746_v21 = vlaneseq  ;;  %p1067_p13 = scmp.ne.s32.totalorder %s779_s29, %s1066_s7 }
  0x3f   : > { %937 = vmatprep.subr.bf16.mxu0 %v1128_v48  ;;  %957 = vmatprep.subr.bf16.mxu1 %v1128_v48  ;;  %v755_v51 = vld [vmem:[%s1425_s3] sm:$0xff]  ;;  %v1043_v53 = vld [vmem:[%s1327_s14 + $0x78] sm:$0xff]   ;;  %v1045_v55 = vld [vmem:[%s1327_s14 + $0x70] sm:$0xff]   ;;  %v748_v23 = vstv %s849_s23  ;;  %s1070_s10 = sshll.u32 %s1131_s9, 4  ;;  %s1071_s10 = int_to_ptr.vmem [resolvable:$false] %s1070_s10 }
  0x40   : > { %953 = vmatprep.mubr.msk.bf16.mxu0 %vm1129_vm0, %v1128_v48  ;;  %973 = vmatprep.mubr.msk.bf16.mxu1 %vm1129_vm0, %v1128_v48  ;;  %v1046_v56 = vld [vmem:[%s1327_s14 + $0x28] sm:$0xff]   ;;  %v1048_v58 = vld [vmem:[%s1327_s14 + $0x20] sm:$0xff]   ;;  %v1050_v60 = vld [vmem:[%s1327_s14 + $0x18] sm:$0xff]   ;;  %v747_v22 = vand.u32 127, %v746_v21  ;;  %p1068_p0 = pnand %p1067_p13, %p1195_p6  ;;  %s1072_s11 = scalar_lea.vmem %s1071_s10, 256 }
  0x41   : > { %1041 = vset.pattern.permute.xlu0 %v1130_v50  ;;  %938 = vmatpush3.bf16.msra.mxu0 %v1042_v52  ;;  %v1047_v57 = vld [vmem:[%s1327_s14 + $0x68] sm:$0xff]   ;;  %v1049_v59 = vld [vmem:[%s1327_s14 + $0x60] sm:$0xff]   ;;  %v1051_v61 = vld [vmem:[%s1327_s14 + $0x58] sm:$0xff]   ;;  %p1073_p2 = scmp.lt.s32.totalorder %s779_s29, %s1071_s10  ;;  %p1074_p3 = scmp.lt.s32.totalorder %s1072_s11, %s1066_s7 }
  0x42   : > { %752 = vperm.xlu0 %1041, %v750_v49   ;;  %958 = vmatpush3.bf16.msra.mxu1 %v1043_v53  ;;  %v1052_v62 = vld [vmem:[%s1327_s14 + $0x10] sm:$0xff]   ;;  %v1054_v0 = vld [vmem:[%s1327_s14 + $0x8] sm:$0xff]   ;;  %v1056_v2 = vld [vmem:[%s1327_s14] sm:$0xff]   ;;  %v749_v25 = vadd.s32 %v748_v23, %v747_v22  ;;  %p1069_p1 = pneg %p1068_p0 }
  0x43   : > { %939 = vmatprep.subr.bf16.mxu0 %v1128_v48  ;;  %959 = vmatprep.subr.bf16.mxu1 %v1128_v48  ;;  %v1053_v63 = vld [vmem:[%s1327_s14 + $0x50] sm:$0xff]   ;;  %v1055_v1 = vld [vmem:[%s1327_s14 + $0x48] sm:$0xff]   ;;  %v1057_v3 = vld [vmem:[%s1327_s14 + $0x40] sm:$0xff]   ;;  %p1075_p4 = por %p1074_p3, %p1073_p2 }
  0x44   : > { %v429_v4 = vld [vmem:[%s1422_s0] sm:$0xf]  ;;  %v1058_v5 = vld [vmem:[%s1327_s14 + $0xb8] sm:$0xff]   ;;  %v1059_v6 = vld [vmem:[%s1327_s14 + $0xb0] sm:$0xff]  }
  0x45   : > { %940 = vmatpush3.bf16.msra.mxu0 %v1044_v54  ;;  %v1060_v7 = vld [vmem:[%s1327_s14 + $0xa8] sm:$0xff]   ;;  %v1061_v8 = vld [vmem:[%s1327_s14 + $0xa0] sm:$0xff]   ;;  %v1062_v9 = vld [vmem:[%s1327_s14 + $0x98] sm:$0xff]   ;;  %p1076_p5 = pnand %p1075_p4, %p1069_p1 }
  0x46   : > { %758 = vperm.xlu0 %1041, %v755_v51   ;;  %960 = vmatpush3.bf16.msra.mxu1 %v1045_v55  ;;  %v1063_v10 = vld [vmem:[%s1327_s14 + $0x90] sm:$0xff]   ;;  %v1064_v11 = vld [vmem:[%s1327_s14 + $0x88] sm:$0xff]   ;;  %v1065_v12 = vld [vmem:[%s1327_s14 + $0x80] sm:$0xff]  }
  0x47   : > { %941 = vmatprep.subr.bf16.mxu0 %v1128_v48  ;;  %961 = vmatprep.subr.bf16.mxu1 %v1128_v48 }
  0x49   : > { %942 = vmatpush3.bf16.msra.mxu0 %v1046_v56 }
  0x4a   : > { %962 = vmatpush3.bf16.msra.mxu1 %v1047_v57  ;;  %943 = vmatprep.subr.bf16.mxu0 %v1128_v48 }
  0x4b   : > { %963 = vmatprep.subr.bf16.mxu1 %v1128_v48 }
  0x4d   : > { %944 = vmatpush3.bf16.msra.mxu0 %v1048_v58 }
  0x4e   : > { %964 = vmatpush3.bf16.msra.mxu1 %v1049_v59  ;;  %945 = vmatprep.subr.bf16.mxu0 %v1128_v48 }
  0x4f   : > { %965 = vmatprep.subr.bf16.mxu1 %v1128_v48 }
  0x51   : > { %946 = vmatpush3.bf16.msra.mxu0 %v1050_v60 }
  0x52   : > { %966 = vmatpush3.bf16.msra.mxu1 %v1051_v61  ;;  %947 = vmatprep.subr.bf16.mxu0 %v1128_v48 }
  0x53   : > { %967 = vmatprep.subr.bf16.mxu1 %v1128_v48 }
  0x55   : > { %948 = vmatpush3.bf16.msra.mxu0 %v1052_v62 }
  0x56   : > { %968 = vmatpush3.bf16.msra.mxu1 %v1053_v63  ;;  %949 = vmatprep.subr.bf16.mxu0 %v1128_v48 }
  0x57   : > { %969 = vmatprep.subr.bf16.mxu1 %v1128_v48 }
  0x59   : > { %950 = vmatpush3.bf16.msra.mxu0 %v1054_v0 }
  0x5a   : > { %970 = vmatpush3.bf16.msra.mxu1 %v1055_v1  ;;  %951 = vmatprep.subr.bf16.mxu0 %v1128_v48 }
  0x5b   : > { %971 = vmatprep.subr.bf16.mxu1 %v1128_v48 }
  0x5d   : > { %952 = vmatpush3.bf16.msra.mxu0 %v1056_v2 }
  0x5e   : > { %972 = vmatpush3.bf16.msra.mxu1 %v1057_v3  ;;  %977 = vmatprep.subr.bf16.mxu0 %v1128_v48 }
  0x60   : > { %954 = vmatmul.mubr.bf16.vlgmr.msra.gmra.mxu0 %v429_v4 }
  0x61   : > { %974 = vmatmul.mubr.bf16.vlgmr.msra.gmra.mxu1 %v429_v4  ;;  %978 = vmatpush3.bf16.msra.mxu0 %v1058_v5 }
  0x62   : > { %979 = vmatprep.subr.bf16.mxu0 %v1128_v48  ;;  %993 = vmatprep.mubr.msk.bf16.mxu0 %vm1129_vm0, %v1128_v48 }
  0x65   : > { %980 = vmatpush3.bf16.msra.mxu0 %v1059_v6 }
  0x66   : > { %981 = vmatprep.subr.bf16.mxu0 %v1128_v48 }
  0x69   : > { %982 = vmatpush3.bf16.msra.mxu0 %v1060_v7 }
  0x6a   : > { %983 = vmatprep.subr.bf16.mxu0 %v1128_v48 }
  0x6d   : > { %984 = vmatpush3.bf16.msra.mxu0 %v1061_v8 }
  0x6e   : > { %985 = vmatprep.subr.bf16.mxu0 %v1128_v48 }
  0x71   : > { %986 = vmatpush3.bf16.msra.mxu0 %v1062_v9 }
  0x72   : > { %987 = vmatprep.subr.bf16.mxu0 %v1128_v48 }
  0x75   : > { %988 = vmatpush3.bf16.msra.mxu0 %v1063_v10 }
  0x76   : > { %989 = vmatprep.subr.bf16.mxu0 %v1128_v48 }
  0x79   : > { %990 = vmatpush3.bf16.msra.mxu0 %v1064_v11 }
  0x7a   : > { %991 = vmatprep.subr.bf16.mxu0 %v1128_v48 }
  0x7d   : > { %992 = vmatpush3.bf16.msra.mxu0 %v1065_v12 }
  0x80   : > { %994 = vmatmul.mubr.bf16.vlgmr.msra.gmra.mxu0 %v429_v4 }
  0xbd   : > { %v753_v24 = vpop.permute.xlu0 %752 }
  0xbe   : > { %vm754_vm1 = vcmp.eq.s32.totalorder %v749_v25, %v753_v24 }
  0xc1   : > { %v759_v29 = vpop.permute.xlu0 %758 }
 0x120   : > { %v528_v13 = vpop.f32.mrf.mxu0 }
 0x121   : > { %v633_v14 = vpop.f32.mrf.mxu1 }
 0x122   : > { %v955_v15 = vpop.f32.mrf.mxu0  ;;  %v639_v26 = vmax.f32 %v528_v13, %v633_v14 }
 0x123   : > { %v975_v16 = vpop.f32.mrf.mxu1 }
 0x124   : > { %v531_v17 = vpop.f32.mrf.mxu0 }
 0x125   : > { %v636_v18 = vpop.f32.mrf.mxu1 }
 0x126   : > { %v956_v19 = vpop.f32.mrf.mxu0 }
 0x127   : > { %v976_v20 = vpop.f32.mrf.mxu1 }
 0x140   : > { %v739_v27 = vpop.f32.mrf.mxu0 }
 0x141   : > { %v745_v28 = vmax.f32 %v639_v26, %v739_v27 }
 0x142   : > { %v995_v30 = vpop.f32.mrf.mxu0 }
 0x143   : > { %v761_v31 = vsel %vm754_vm1, %v759_v29, %v745_v28 }
 0x144   : > { %v762_v32 = vmul.f32 45.0, %v761_v31  ;;  %v742_v33 = vpop.f32.mrf.mxu0 }
 0x146   : > { %v996_v34 = vpop.f32.mrf.mxu0  ;;  %763 = vst [vmem:[%s426_s28] sm:$0xff] %v762_v32 }
 0x147   : > { %1079 = shalt.err (!%p1076_p5)
}
 0x148   : > { %s1080_s12 = scalar_lea.hbm %s1386_s5, 128  ;;  %s1084_s14 = scalar_lea.hbm %s1426_s4, 512 }
 0x149   : > { %p1081_p7 = scmp.ne.s32.totalorder %s1386_s5, %s1080_s12  ;;  %p1085_p11 = scmp.lt.s32.totalorder %s1386_s5, %s1426_s4 }
 0x14a   : > { %p1086_p12 = scmp.lt.s32.totalorder %s1084_s14, %s1080_s12 }
 0x14b   : > { %p1082_p9 = pnand %p1081_p7, %p1195_p6 }
 0x14c   : > { %p1087_p13 = por %p1086_p12, %p1085_p11 }
 0x14d   : > { %p1083_p10 = pneg %p1082_p9 }
 0x14f   : > { %p1088_p0 = pnand %p1087_p13, %p1083_p10 }
 0x151   : > { %1091 = shalt.err (!%p1088_p0)
}
 0x152   : > { %999 = dma.vmem_to_hbm [thread:$0]  (%p1195_p6), %s779_s29, 128, %s1386_s5, %s765_s6  }
 0x153 PF: > { %p1005_p1 = scmp.ge.s32.totalorder %s1126_s18, 2  ;;  %s790_s23 = sand.u32 1, %s1114_s15  }
 0x154   : > { %s791_s27 = scalar_lea.sflag [#allocation4], %s790_s23 }
 0x155   : > { %p1002_p2 = pnand %p1005_p1, %p1199_p8 }
 0x157   : > { %p1003_p3 = pneg %p1002_p2 }
 0x159   : > { %1109 = dma.done.wait (%p1003_p3), %s791_s27, 128  }
 0x15a   : > { %1111 = vsyncadd (%p1003_p3), %s791_s27, 4294967168  ;;  %p14_p4 = scmp.ge.s32.totalorder %s1180_s21, 6   ;;  %s1429_s15 = smov %s1118_s16 }
 0x15b   : > { %s1430_s16 = smov %s1122_s17  ;;  %s1431_s17 = smov %s1193_s24 }
 0x15c   : > { %s1432_s18 = smov %s1180_s21  ;;  %16 = sbr.rel (!%p14_p4) target bundleno = 3 (0x3), region = 119 }
 0x161   :  { %796 = vsyncpa [#allocation4], 1 }
 0x162   :  { %798 = vsyncpa [#allocation4 + $0x1], 1 }

</bundles_post_ra>
